<compile_context>
chip_gen: v6e
topology: v6e:2x2x1
jax: 0.10.0
libtpu: 0.0.40
codegen_flags: <defaults>
</compile_context>

<pallas_src>
import math
import numpy as np
import jax
import jax.numpy as jnp
from jax import lax
from jax.experimental import pallas as pl
from jax.experimental.pallas import tpu as pltpu

_LANES = 128


# ---------------------------------------------------------------------------
# Glue: build freqs_cos / freqs_sin exactly as VisionRotaryEmbeddingFast.__init__,
# plus a host-precomputed sign-baked sin table for the kernel.
# ---------------------------------------------------------------------------
def build_vision_rope_buffers(dim, pt_seq_len=16, freqs_for="lang",
                              theta=10000.0, max_freq=10.0, num_freqs=1):
    """Returns (freqs_cos, freqs_sin, freqs_sin_signed), each (N, C) float32.

    freqs_sin_signed has rotate_half's sign/parity baked in: column c is
    multiplied by -1 for even c, +1 for odd c (so the kernel needs one table).
    """
    if freqs_for == "lang":
        freqs = 1.0 / theta ** (np.arange(0, dim, 2)[: dim // 2].astype(np.float32) / dim)
    elif freqs_for == "pixel":
        freqs = np.linspace(1.0, max_freq / 2, dim // 2, dtype=np.float32) * math.pi
    elif freqs_for == "constant":
        freqs = np.ones(num_freqs, dtype=np.float32)
    else:
        raise ValueError(f"unknown modality {freqs_for}")

    ft_seq_len = pt_seq_len
    t = np.arange(ft_seq_len, dtype=np.float32) / ft_seq_len * pt_seq_len   # == arange
    f2d = t[:, None] * freqs[None, :]                     # (S, dim//2)
    f2d = np.repeat(f2d, 2, axis=-1)                      # '... n -> ... (n r)', r=2

    # broadcat((f2d[:, None, :], f2d[None, :, :]), dim=-1) -> (S, S, 2*dim)
    a = np.broadcast_to(f2d[:, None, :], (ft_seq_len, ft_seq_len, f2d.shape[-1]))
    b = np.broadcast_to(f2d[None, :, :], (ft_seq_len, ft_seq_len, f2d.shape[-1]))
    fcat = np.concatenate([a, b], axis=-1)                # (S, S, 2*dim)

    freqs_cos = np.cos(fcat).reshape(-1, fcat.shape[-1]).astype(np.float32)   # (N, C)
    freqs_sin = np.sin(fcat).reshape(-1, fcat.shape[-1]).astype(np.float32)

    N, C = freqs_cos.shape
    H = W = int(np.sqrt(N))
    freqs_cos = freqs_cos.reshape(2, H // 2, 2, W // 2, C)
    freqs_sin = freqs_sin.reshape(2, H // 2, 2, W // 2, C)
    freqs_cos = np.einsum("hpwqc->hwpqc", freqs_cos).reshape(N, C)
    freqs_sin = np.einsum("hpwqc->hwpqc", freqs_sin).reshape(N, C)

    # rotate_half sign baking (host-side, once):
    #   even channel c: out[c] = x[c]*cos[c] - x[c+1]*sin[c]  ->  signed_sin[c] = -sin[c]
    #   odd  channel c: out[c] = x[c]*cos[c] + x[c-1]*sin[c]  ->  signed_sin[c] = +sin[c]
    sign = np.where(np.arange(C) % 2 == 0, -1.0, 1.0).astype(np.float32)
    freqs_sin_signed = freqs_sin * sign[None, :]

    return (jnp.asarray(freqs_cos), jnp.asarray(freqs_sin),
            jnp.asarray(freqs_sin_signed))


# ---------------------------------------------------------------------------
# Pallas kernel: out = x*cos + x_swap*sin_signed with x_swap = neighbour swap
# (even lane takes its right neighbour, odd lane its left neighbour).
# ---------------------------------------------------------------------------
def _rope_kernel(x_ref, cos_ref, sin_ref, o_ref):
    x = x_ref[...]                                   # (reps, rows, 128) lane-dense
    lane_axis = x.ndim - 1
    lanes = x.shape[-1]
    # Pair swap via two non-negative XLU lane rotations (XLU slot, not VPU):
    #   x_next[j] = x[(j+1) % lanes],  x_prev[j] = x[(j-1) % lanes]
    x_next = pltpu.roll(x, shift=lanes - 1, axis=lane_axis)
    x_prev = pltpu.roll(x, shift=1, axis=lane_axis)
    # Channel parity == lane parity (both C and 128 are even), and a (even, odd)
    # pair never straddles a 128-lane row, so the rolls' wrap-around lanes are
    # never selected by the parity mask.
    lane = lax.broadcasted_iota(jnp.int32, x.shape, lane_axis)
    x_swap = jnp.where(lane % 2 == 0, x_next, x_prev)
    # cos/sin are (rows, 128); broadcast over the leading reps axis is free.
    out = x * cos_ref[...] + x_swap * sin_ref[...]
    o_ref[...] = out.astype(o_ref.dtype)


# ---------------------------------------------------------------------------
# Block planner: >= 4 grid steps (even for v7x dual-TC), <= max_block_bytes per
# x block; split along period_rows if a single (b,h) slice exceeds the budget.
# ---------------------------------------------------------------------------
def _plan_blocks(bh, period_rows, itemsize, max_block_bytes=1 << 20, min_steps=4):
    """Returns (reps_per_block, n_bh_blocks, block_rows, n_row_blocks)."""
    rep_bytes = period_rows * _LANES * itemsize
    if rep_bytes <= max_block_bytes:
        max_reps = max(1, max_block_bytes // rep_bytes)
        n_bh_blocks = max(min_steps, -(-bh // max_reps))
        n_bh_blocks += n_bh_blocks % 2            # even block count (v7x dual-TC)
        n_bh_blocks = min(bh, n_bh_blocks)
        reps_per_block = -(-bh // n_bh_blocks)
        n_bh_blocks = -(-bh // reps_per_block)
        return reps_per_block, n_bh_blocks, period_rows, 1
    # A single (b, h) slice alone exceeds the budget: also split along period_rows.
    sub = 8 * max(1, 4 // itemsize)               # dtype-aware sublane quantum
    block_rows = max(sub, (max_block_bytes // (_LANES * itemsize)) // sub * sub)
    block_rows = min(block_rows, period_rows)
    n_row_blocks = -(-period_rows // block_rows)
    return 1, bh, block_rows, n_row_blocks


# ---------------------------------------------------------------------------
# Wrapper
# ---------------------------------------------------------------------------
def vision_rope_fast(x, freqs_cos, freqs_sin_signed, scale_index=None,
                     seq_len=256, clusters=4):
    """x: (B, heads, N, C).  Returns x * cos + rotate_half(x) * sin, same shape."""
    B, Hh, N, C = x.shape
    assert C % 2 == 0, "channel dim must be even (rotate_half pairs)"
    assert (N * C) % _LANES == 0, "N*C must be a multiple of 128 for lane-dense layout"

    if scale_index is None:
        assert freqs_cos.shape[0] == N and freqs_sin_signed.shape[0] == N
        cos, sin = freqs_cos, freqs_sin_signed
    else:
        end = (scale_index + 1) * seq_len // clusters
        start = end - N
        if isinstance(scale_index, int):
            assert 0 <= start and end <= freqs_cos.shape[0], (
                f"scale_index={scale_index} selects rows [{start}:{end}] outside "
                f"the frequency table of length {freqs_cos.shape[0]}")
        # TODO(synk): for a traced scale_index, lax.dynamic_slice clamps an
        # out-of-range start instead of raising; callers must pass a valid index.
        cos = lax.dynamic_slice_in_dim(freqs_cos, start, N, axis=0)
        sin = lax.dynamic_slice_in_dim(freqs_sin_signed, start, N, axis=0)

    # Lane-dense relayout: (B, H, N, C) -> (B*H, N*C/128, 128).  Full vregs,
    # unmasked full-width output stores; tables stay at their natural size.
    bh = B * Hh
    period_rows = (N * C) // _LANES
    x3 = x.reshape(bh, period_rows, _LANES)
    cos2 = cos.astype(jnp.float32).reshape(period_rows, _LANES)
    sin2 = sin.astype(jnp.float32).reshape(period_rows, _LANES)

    reps_per_block, n_bh_blocks, block_rows, n_row_blocks = _plan_blocks(
        bh, period_rows, x.dtype.itemsize)

    # Grid order: row blocks outer, (b,h) blocks inner -> the table block index is
    # invariant over the inner axis, so each table tile is DMA'd once per row block
    # and stays resident in VMEM; only x and out stream from/to HBM.
    x_spec = pl.BlockSpec((reps_per_block, block_rows, _LANES),
                          lambda r, b: (b, r, 0))
    tbl_spec = pl.BlockSpec((block_rows, _LANES), lambda r, b: (r, 0))

    out = pl.pallas_call(
        _rope_kernel,
        out_shape=jax.ShapeDtypeStruct(x3.shape, x.dtype),
        grid_spec=pltpu.PrefetchScalarGridSpec(
            num_scalar_prefetch=0,
            grid=(n_row_blocks, n_bh_blocks),
            in_specs=[x_spec, tbl_spec, tbl_spec],
            out_specs=x_spec,
        ),
        compiler_params=pltpu.CompilerParams(
            dimension_semantics=("parallel", "parallel")),
    )(x3, cos2, sin2)
    return out.reshape(B, Hh, N, C)


# ---------------------------------------------------------------------------
# Pure-JAX reference for validation
# ---------------------------------------------------------------------------
def _rotate_half_ref(x):
    xr = x.reshape(*x.shape[:-1], x.shape[-1] // 2, 2)
    x1, x2 = xr[..., 0], xr[..., 1]
    return jnp.stack((-x2, x1), axis=-1).reshape(x.shape)


def _rope_ref(x, cos, sin):
    return x * cos + _rotate_half_ref(x) * sin


if __name__ == "__main__":
    dim = 16            # module's embedding dim parameter -> C = 2*dim = 32
    pt_seq_len = 16     # -> N = 256 (module default)
    B, heads = 2, 4

    freqs_cos, freqs_sin, freqs_sin_signed = build_vision_rope_buffers(
        dim, pt_seq_len=pt_seq_len)
    N, C = freqs_cos.shape          # (256, 32)

    key = jax.random.PRNGKey(0)
    x = jax.random.normal(key, (B, heads, N, C), dtype=jnp.float32)

    # main path (scale_index=None)
    out = jax.block_until_ready(vision_rope_fast(x, freqs_cos, freqs_sin_signed))
    ref = _rope_ref(x, freqs_cos, freqs_sin)
    assert out.shape == x.shape and out.dtype == x.dtype
    assert jnp.allclose(out, ref, atol=1e-5, rtol=1e-5)

    # scale_index path: N=64 tokens use rows [64:128] of the tables
    x_s = jax.random.normal(jax.random.PRNGKey(1), (B, heads, 64, C), dtype=jnp.float32)
    out_s = jax.block_until_ready(
        vision_rope_fast(x_s, freqs_cos, freqs_sin_signed, scale_index=1))
    ref_s = _rope_ref(x_s, freqs_cos[64:128], freqs_sin[64:128])
    assert jnp.allclose(out_s, ref_s, atol=1e-5, rtol=1e-5)

    print("KERNEL_OK")
</pallas_src>

<mosaic_0001>
module attributes {stable_mosaic.version = 11 : i64} {
  func.func @_rope_kernel(%arg0: i32, %arg1: i32, %arg2: memref<2x64x128xf32, #tpu.memory_space<vmem>>, %arg3: memref<64x128xf32, #tpu.memory_space<vmem>>, %arg4: memref<64x128xf32, #tpu.memory_space<vmem>>, %arg5: memref<2x64x128xf32, #tpu.memory_space<vmem>>) attributes {dimension_semantics = [#tpu.dimension_semantics<parallel>, #tpu.dimension_semantics<parallel>], iteration_bounds = array<i64: 1, 4>, scalar_prefetch = 0 : i64, scratch_operands = 0 : i64, tpu.core_type = #tpu.core_type<tc>, window_params = [{transform_indices = @transform_0, window_bounds = array<i64: 2, 64, 128>}, {transform_indices = @transform_1, window_bounds = array<i64: 64, 128>}, {transform_indices = @transform_2, window_bounds = array<i64: 64, 128>}, {transform_indices = @transform_3, window_bounds = array<i64: 2, 64, 128>}]} {
    %c0 = arith.constant 0 : index
    %c0_0 = arith.constant 0 : index
    %c0_1 = arith.constant 0 : index
    %0 = vector.load %arg2[%c0, %c0_0, %c0_1] : memref<2x64x128xf32, #tpu.memory_space<vmem>>, vector<2x64x128xf32>
    %c127_i32 = arith.constant 127 : i32
    %1 = tpu.dynamic_rotate %0 by %c127_i32 dim 2 : vector<2x64x128xf32>, i32 -> vector<2x64x128xf32>
    %c1_i32 = arith.constant 1 : i32
    %2 = tpu.dynamic_rotate %0 by %c1_i32 dim 2 : vector<2x64x128xf32>, i32 -> vector<2x64x128xf32>
    %3 = tpu.iota {dimensions = array<i32: 2>} : vector<2x64x128xi32>
    %c2_i32 = arith.constant 2 : i32
    %c0_i32 = arith.constant 0 : i32
    %4 = arith.cmpi eq, %c2_i32, %c0_i32 : i32
    %c1_i32_2 = arith.constant 1 : i32
    %5 = arith.select %4, %c1_i32_2, %c2_i32 : i32
    %6 = vector.broadcast %5 : i32 to vector<2x64x128xi32>
    %7 = arith.remsi %3, %6 : vector<2x64x128xi32>
    %c0_i32_3 = arith.constant 0 : i32
    %8 = vector.broadcast %c0_i32_3 : i32 to vector<2x64x128xi32>
    %9 = arith.cmpi ne, %7, %8 : vector<2x64x128xi32>
    %c0_i32_4 = arith.constant 0 : i32
    %10 = vector.broadcast %c0_i32_4 : i32 to vector<2x64x128xi32>
    %11 = arith.cmpi slt, %7, %10 : vector<2x64x128xi32>
    %c0_i32_5 = arith.constant 0 : i32
    %12 = arith.cmpi slt, %5, %c0_i32_5 : i32
    %13 = vector.broadcast %12 : i1 to vector<2x64x128xi1>
    %14 = vector.broadcast %13 : vector<2x64x128xi1> to vector<2x64x128xi1>
    %15 = arith.xori %11, %14 : vector<2x64x128xi1>
    %16 = arith.andi %15, %9 : vector<2x64x128xi1>
    %17 = vector.broadcast %5 : i32 to vector<2x64x128xi32>
    %18 = arith.addi %7, %17 : vector<2x64x128xi32>
    %19 = arith.select %16, %18, %7 : vector<2x64x128xi1>, vector<2x64x128xi32>
    %c0_i32_6 = arith.constant 0 : i32
    %20 = vector.broadcast %c0_i32_6 : i32 to vector<2x64x128xi32>
    %21 = arith.cmpi eq, %19, %20 : vector<2x64x128xi32>
    %22 = arith.select %21, %1, %2 : vector<2x64x128xi1>, vector<2x64x128xf32>
    %c0_7 = arith.constant 0 : index
    %c0_8 = arith.constant 0 : index
    %23 = vector.load %arg3[%c0_7, %c0_8] : memref<64x128xf32, #tpu.memory_space<vmem>>, vector<64x128xf32>
    %24 = vector.shape_cast %23 : vector<64x128xf32> to vector<1x64x128xf32>
    %25 = vector.broadcast %24 : vector<1x64x128xf32> to vector<2x64x128xf32>
    %26 = arith.mulf %0, %25 : vector<2x64x128xf32>
    %c0_9 = arith.constant 0 : index
    %c0_10 = arith.constant 0 : index
    %27 = vector.load %arg4[%c0_9, %c0_10] : memref<64x128xf32, #tpu.memory_space<vmem>>, vector<64x128xf32>
    %28 = vector.shape_cast %27 : vector<64x128xf32> to vector<1x64x128xf32>
    %29 = vector.broadcast %28 : vector<1x64x128xf32> to vector<2x64x128xf32>
    %30 = arith.mulf %22, %29 : vector<2x64x128xf32>
    %31 = arith.addf %26, %30 : vector<2x64x128xf32>
    %c0_11 = arith.constant 0 : index
    %c0_12 = arith.constant 0 : index
    %c0_13 = arith.constant 0 : index
    %32 = vector.load %arg5[%c0_11, %c0_12, %c0_13] : memref<2x64x128xf32, #tpu.memory_space<vmem>>, vector<2x64x128xf32>
    tpu.vector_store %arg5[%c0_11, %c0_12, %c0_13], %31 {strides = array<i32>} : memref<2x64x128xf32, #tpu.memory_space<vmem>>, vector<2x64x128xf32>,
    return
  }
  func.func @transform_0(%arg0: i32, %arg1: i32) -> (i32, i32, i32) {
    %c0_i32 = arith.constant 0 : i32
    %c0_i32_0 = arith.constant 0 : i32
    return %arg1, %arg0, %c0_i32 : i32, i32, i32
  }
  func.func @transform_1(%arg0: i32, %arg1: i32) -> (i32, i32) {
    %c0_i32 = arith.constant 0 : i32
    %c0_i32_0 = arith.constant 0 : i32
    return %arg0, %c0_i32 : i32, i32
  }
  func.func @transform_2(%arg0: i32, %arg1: i32) -> (i32, i32) {
    %c0_i32 = arith.constant 0 : i32
    %c0_i32_0 = arith.constant 0 : i32
    return %arg0, %c0_i32 : i32, i32
  }
  func.func @transform_3(%arg0: i32, %arg1: i32) -> (i32, i32, i32) {
    %c0_i32 = arith.constant 0 : i32
    %c0_i32_0 = arith.constant 0 : i32
    return %arg1, %arg0, %c0_i32 : i32, i32, i32
  }
}

</mosaic_0001>

<bundles_post_ra>
// kernel: tpu_custom_call.1
= control target key start
LH: loop header
LB: loop body
LE: loop exit
PB: predicated region body
PF: predicated region fallthrough
CT: control target
= control target key end

     0   :  { %8 = vsyncpa [#allocation3], 0  ;;  %s1313_s0 = inlined_call_operand.hbm [shape: f32[8,64,128], index: 0, kind: input, shape index: {}]   ;;  %s1314_s1 = inlined_call_operand.hbm [shape: f32[64,128], index: 1, kind: input, shape index: {}]   ;;  %s1315_s2 = inlined_call_operand.hbm [shape: f32[64,128], index: 2, kind: input, shape index: {}]   ;;  %s1316_s3 = inlined_call_operand.hbm [shape: f32[8,64,128], index: 3, kind: output, shape index: {}]  }
   0x1   :  { %10 = vsyncpa [#allocation3 + $0x1], 0 }
   0x2   :  { %11 = vsyncpa [#allocation6], 0 }
   0x3   :  { %12 = vsyncpa [#allocation4], 0 }
   0x4   :  { %14 = vsyncpa [#allocation4 + $0x1], 0  ;;  %s887_s12 = smov 0   ;;  %s889_s13 = smov 0  }
   0x5   :  { %s891_s14 = smov 0   ;;  %s893_s15 = smov 0  }
   0x6   :  { %s895_s16 = smov 0   ;;  %s897_s17 = smov 0  }
   0x7 LB: > { %s577_s18 = sadd.s32 4294967295, %s855_s17   ;;  %s578_s19 = sadd.s32 4294967294, %s855_s17   ;;  %s855_s17 = sphi %s897_s17, %s20_s17   ;;  %s851_s16 = sphi %s895_s16, %s1334_s16   ;;  %s847_s15 = sphi %s893_s15, %s1333_s15   ;;  %s843_s14 = sphi %s891_s14, %s1332_s14   ;;  %s839_s13 = sphi %s889_s13, %s1331_s13   ;;  %s835_s12 = sphi %s887_s12, %s1330_s12  }
   0x8   : > { %p54_p0 = scmp.ne.s32.totalorder %s839_s13, %s835_s12  ;;  %p921_p1 = scmp.eq.s32.totalorder %s577_s18, 0 }
   0x9   : > { %p925_p2 = scmp.eq.s32.totalorder %s577_s18, 3  ;;  %p138_p3 = scmp.eq.s32.totalorder %s578_s19, 3 }
   0xa   : > { %p931_p4 = por %p921_p1, %p54_p0  ;;  %p579_p5 = scmp.ge.s32.totalorder %s855_s17, 1 }
   0xb   : > { %p936_p6 = por %p138_p3, %p54_p0  ;;  %p145_p7 = scmp.lt.s32.totalorder %s855_s17, 5 }
   0xc   : > { %s857_s25 = smov [#allocation5]   ;;  %s858_s28 = smov [#allocation7]  }
   0xd   : > { %s1321_s23 = scalar_select %p936_p6, 1, 0 }
   0xe   : > { %p941_p8 = pnand %p579_p5, %p145_p7  ;;  %s160_s26 = sshll.u32 %s857_s25, 4  ;;  %s161_s26 = int_to_ptr.vmem [resolvable:$true] %s160_s26 }
   0xf   : > { %s176_s29 = sshll.u32 %s858_s28, 4  ;;  %s702_s30 = scalar_lea.vmem %s161_s26, 1024  ;;  %s177_s29 = int_to_ptr.vmem [resolvable:$true] %s176_s29 }
  0x10   : > { %p614_p9 = pneg %p941_p8  ;;  %p703_p12 = scmp.ne.s32.totalorder %s161_s26, %s702_s30 }
  0x11   : > { %p710_p3 = scmp.lt.s32.totalorder %s161_s26, %s161_s26  ;;  %p711_p5 = scmp.lt.s32.totalorder %s702_s30, %s702_s30 }
  0x12   : > { %p949_p10 = pnand %p614_p9, %p921_p1 }
  0x13   : > { %p712_p7 = por %p711_p5, %p710_p3 }
  0x14   : > { %p693_p11 = pneg %p949_p10 }
  0x16   : > { %p705_p13 = pnand %p703_p12, %p693_p11 }
  0x18   : > { %p706_p0 = pneg %p705_p13 }
  0x1a   : > { %p713_p9 = pnand %p712_p7, %p706_p0 }
  0x1c   : > { %716 = shalt.err (!%p713_p9)
}
  0x1d   : > { %s1317_s4 = smov 128   ;;  %s860_s5 = smov 8  }
  0x1e   : > { %617 = dma.hbm_to_vmem [thread:$0]  (!%p949_p10), %s1314_s1, 1024, %s161_s26, [#allocation6], %s1317_s4, %s1317_s4, %s860_s5  }
  0x1f   : > { %s728_s8 = scalar_lea.vmem %s177_s29, 1024  ;;  %p736_p0 = scmp.lt.s32.totalorder %s177_s29, %s177_s29 }
  0x20   : > { %p729_p12 = scmp.ne.s32.totalorder %s177_s29, %s728_s8  ;;  %p737_p5 = scmp.lt.s32.totalorder %s728_s8, %s728_s8 }
  0x22   : > { %p731_p13 = pnand %p729_p12, %p693_p11  ;;  %p738_p7 = por %p737_p5, %p736_p0 }
  0x24   : > { %p732_p3 = pneg %p731_p13 }
  0x26   : > { %p739_p9 = pnand %p738_p7, %p732_p3 }
  0x28   : > { %742 = shalt.err (!%p739_p9)
}
  0x29   : > { %620 = dma.hbm_to_vmem [thread:$0]  (!%p949_p10), %s1315_s2, 1024, %s177_s29, [#allocation6], %s1317_s4, %s1317_s4, %s860_s5  }
  0x2a   : > { %s29_s11 = sadd.s32 1, %s851_s16  ;;  %s41_s18 = sadd.s32 1, %s843_s14 }
  0x2b   : > { %p30_p11 = scmp.ge.s32.totalorder %s29_s11, 4  ;;  %p48_p12 = scmp.ne.s32.totalorder %s843_s14, %s839_s13 }
  0x2c   : > { %p49_p13 = scmp.eq.s32.totalorder %s855_s17, 0  ;;  %p631_p3 = scmp.lt.s32.totalorder %s855_s17, 4 }
  0x2d   : > { %s1336_s11 = smov (%p30_p11, %s29_s11), 0  ;;  %p987_p5 = por %p925_p2, %p48_p12 }
  0x2e   : > { %p50_p0 = por %p49_p13, %p48_p12  ;;  %s36_s25 = ssub.s32 %s851_s16, %s1336_s11 }
  0x2f   : > { %s190_s26 = sand.u32 1, %s843_s14   ;;  %p39_p7 = scmp.eq.s32.totalorder %s36_s25, 0 }
  0x30   : > { %s583_s27 = sshll.u32 %s190_s26, 7  ;;  %s599_s28 = sshll.u32 %s851_s16, 11 }
  0x31   : > { %s996_s29 = scalar_select %p39_p7, %s843_s14, %s41_s18  }
  0x32   : > { %s203_s7 = scalar_lea.hbm %s1313_s0, %s599_s28  ;;  %s194_s8 = scalar_lea.vmem [#allocation2], %s583_s27 }
  0x33   : > { %s204_s9 = sshll.u32 %s194_s8, 4  ;;  %p1003_p10 = pnand %p631_p3, %p50_p0  ;;  %s205_s9 = int_to_ptr.vmem [resolvable:$true] %s204_s9 }
  0x34   : > { %s191_s10 = scalar_lea.sflag [#allocation3], %s190_s26  ;;  %s756_s25 = scalar_lea.vmem %s205_s9, 2048 }
  0x35   : > { %p745_p2 = pneg %p1003_p10  ;;  %p757_p9 = scmp.ne.s32.totalorder %s205_s9, %s756_s25 }
  0x36   : > { %s861_s18 = smov [#allocation2]  }
  0x37   : > { %p759_p11 = pnand %p757_p9, %p745_p2  ;;  %s761_s4 = sshll.u32 %s861_s18, 4  ;;  %s762_s4 = int_to_ptr.vmem [resolvable:$false] %s761_s4 }
  0x38   : > { %s763_s28 = scalar_lea.vmem %s762_s4, 4096  ;;  %p764_p13 = scmp.lt.s32.totalorder %s205_s9, %s762_s4 }
  0x39   : > { %p760_p12 = pneg %p759_p11  ;;  %p765_p7 = scmp.lt.s32.totalorder %s763_s28, %s756_s25 }
  0x3b   : > { %p766_p6 = por %p765_p7, %p764_p13 }
  0x3d   : > { %p767_p3 = pnand %p766_p6, %p760_p12 }
  0x3f   : > { %770 = shalt.err (!%p767_p3)
}
  0x40   : > { %s1326_s27 = smov 128   ;;  %216 = sbr.rel (%p941_p8) target bundleno = 267 (0x10b), region = 32 }
  0x41   : > { %624 = dma.hbm_to_vmem [thread:$0]  (!%p1003_p10), %s203_s7, 2048, %s205_s9, %s191_s10, %s1326_s27, %s1326_s27, %s860_s5  }
  0x42   : > { %s1017_s26 = sand.u32 (!%p941_p8), 1, %s839_s13  }
  0x43   : > { %s588_s4 = sshll.u32 (!%p941_p8), %s1017_s26, 7  ;;  %s219_s30 = scalar_lea.sflag (!%p941_p8), [#allocation3], %s1017_s26 }
  0x44   : > { %s1023_s6 = scalar_lea.vmem (!%p941_p8), [#allocation2], %s588_s4 }
  0x45   : > { %822 = dma.done.wait (%p931_p4), %s219_s30, 2048  }
  0x46   : > { %824 = vsyncadd (%p931_p4), %s219_s30, 4294965248 }
  0x47   : > { %826 = dma.done.wait (%p921_p1), [#allocation6], 2048  }
  0x48   : > { %828 = vsyncadd (%p921_p1), [#allocation6], 4294965248  ;;  %v1034_v0 = vld [vmem:[%s1023_s6 + $0x10] sm:$0xff]  ;;  %v1037_v1 = vld [vmem:[%s1023_s6] sm:$0xff]  ;;  %s862_s22 = smov 127   ;;  %s863_s20 = smov 1   ;;  %v339_v26 = vlaneseq }
  0x49   : > { %279 = vrot.lane.b32.xlu1 %v1034_v0, %s862_s22  ;;  %275 = vrot.lane.b32.xlu0 %v1037_v1, %s862_s22  ;;  %v1042_v2 = vld [vmem:[%s1023_s6 + $0x18] sm:$0xff]  ;;  %v1045_v3 = vld [vmem:[%s1023_s6 + $0x8] sm:$0xff]  ;;  %v1133_v35 = vld [vmem:[#allocation5] sm:$0xff]  ;;  %s1174_s24 = scalar_lea.vmem [#allocation8], %s588_s4  ;;  %s601_s5 = sshll.u32 %s847_s15, 11 }
  0x4a   : > { %v1050_v4 = vld [vmem:[%s1023_s6 + $0x28] sm:$0xff]  ;;  %v1053_v5 = vld [vmem:[%s1023_s6 + $0x20] sm:$0xff]  ;;  %v1058_v6 = vld [vmem:[%s1023_s6 + $0x38] sm:$0xff]  ;;  %v340_v29 = vand.u32 127, %v339_v26  ;;  %v378_v40 = vmul.f32 %v1133_v35, %v1037_v1  ;;  %s467_s7 = sshll.u32 %s1174_s24, 4  ;;  %s1262_s21 = scalar_lea.hbm %s1316_s3, %s601_s5  ;;  %s1264_s7 = int_to_ptr.vmem [resolvable:$true] %s467_s7 }
  0x4b   : > { %v1061_v7 = vld [vmem:[%s1023_s6 + $0x30] sm:$0xff]  ;;  %v1066_v8 = vld [vmem:[%s1023_s6 + $0x48] sm:$0xff]  ;;  %v1069_v9 = vld [vmem:[%s1023_s6 + $0x40] sm:$0xff]  ;;  %s451_s15 = scalar_lea.sflag [#allocation4], %s1017_s26  ;;  %s771_s10 = scalar_lea.vmem %s1264_s7, 2048 }
  0x4c   : > { %v1074_v10 = vld [vmem:[%s1023_s6 + $0x58] sm:$0xff]  ;;  %v1077_v11 = vld [vmem:[%s1023_s6 + $0x50] sm:$0xff]  ;;  %v1082_v12 = vld [vmem:[%s1023_s6 + $0x68] sm:$0xff]  ;;  %v345_v32 = vand.u32 1, %v340_v29  ;;  %p772_p1 = scmp.ne.s32.totalorder %s1264_s7, %s771_s10  ;;  %s864_s25 = smov [#allocation8]  }
  0x4d   : > { %281 = vrot.lane.b32.xlu1 %v1042_v2, %s862_s22  ;;  %277 = vrot.lane.b32.xlu0 %v1045_v3, %s862_s22  ;;  %v1085_v13 = vld [vmem:[%s1023_s6 + $0x60] sm:$0xff]  ;;  %v1090_v14 = vld [vmem:[%s1023_s6 + $0x78] sm:$0xff]  ;;  %v371_v36 = vld [vmem:[#allocation5 + $0x8] sm:$0xff]  ;;  %s775_s18 = sshll.u32 %s864_s25, 4  ;;  %s776_s18 = int_to_ptr.vmem [resolvable:$false] %s775_s18 }
  0x4e   : > { %v1093_v15 = vld [vmem:[%s1023_s6 + $0x70] sm:$0xff]  ;;  %vm1135_vm0 = vcmp.eq.s32.totalorder %v345_v32, 0  ;;  %v1139_v38 = vld [vmem:[#allocation7 + $0x8] sm:$0xff]  ;;  %v1141_v39 = vld [vmem:[#allocation7] sm:$0xff]  ;;  %v379_v41 = vmul.f32 %v371_v36, %v1045_v3  ;;  %p773_p4 = pnand %p772_p1, %p987_p5  ;;  %s777_s28 = scalar_lea.vmem %s776_s18, 4096 }
  0x4f   : > { %v1146_v44 = vld [vmem:[#allocation5 + $0x10] sm:$0xff]  ;;  %v1148_v45 = vld [vmem:[#allocation5 + $0x18] sm:$0xff]  ;;  %v1164_v58 = vld [vmem:[#allocation5 + $0x28] sm:$0xff]  ;;  %p778_p8 = scmp.lt.s32.totalorder %s1264_s7, %s776_s18  ;;  %p779_p0 = scmp.lt.s32.totalorder %s777_s28, %s771_s10 }
  0x50   : > { %v1156_v50 = vld [vmem:[#allocation7 + $0x18] sm:$0xff]  ;;  %v1158_v51 = vld [vmem:[#allocation7 + $0x10] sm:$0xff]  ;;  %v380_v52 = vmul.f32 %v1146_v44, %v1034_v0  ;;  %v381_v53 = vmul.f32 %v1148_v45, %v1042_v2  ;;  %v1166_v59 = vld [vmem:[#allocation5 + $0x20] sm:$0xff]  ;;  %p774_p6 = pneg %p773_p4 }
  0x51   : > { %285 = vrot.lane.b32.xlu1 %v1050_v4, %s862_s22  ;;  %283 = vrot.lane.b32.xlu0 %v1053_v5, %s862_s22  ;;  %v377_v26 = vld [vmem:[#allocation5 + $0x38] sm:$0xff]  ;;  %v376_v29 = vld [vmem:[#allocation5 + $0x30] sm:$0xff]  ;;  %p780_p10 = por %p779_p0, %p778_p8 }
  0x53   : > { %p781_p2 = pnand %p780_p10, %p774_p6 }
  0x55   : > { %289 = vrot.lane.b32.xlu1 %v1058_v6, %s862_s22  ;;  %287 = vrot.lane.b32.xlu0 %v1061_v7, %s862_s22 }
  0x59   : > { %293 = vrot.lane.b32.xlu1 %v1066_v8, %s862_s22  ;;  %291 = vrot.lane.b32.xlu0 %v1069_v9, %s862_s22 }
  0x5d   : > { %297 = vrot.lane.b32.xlu1 %v1074_v10, %s862_s22  ;;  %295 = vrot.lane.b32.xlu0 %v1077_v11, %s862_s22 }
  0x61   : > { %301 = vrot.lane.b32.xlu1 %v1082_v12, %s862_s22  ;;  %299 = vrot.lane.b32.xlu0 %v1085_v13, %s862_s22 }
  0x65   : > { %305 = vrot.lane.b32.xlu1 %v1090_v14, %s862_s22  ;;  %303 = vrot.lane.b32.xlu0 %v1093_v15, %s862_s22 }
  0x69   : > { %309 = vrot.lane.b32.xlu1 %v1045_v3, %s863_s20  ;;  %307 = vrot.lane.b32.xlu0 %v1037_v1, %s863_s20  ;;  %v1182_v1 = vld [vmem:[#allocation7 + $0x20] sm:$0xff]  ;;  %v382_v3 = vmul.f32 %v1166_v59, %v1053_v5 }
  0x6d   : > { %313 = vrot.lane.b32.xlu1 %v1042_v2, %s863_s20  ;;  %311 = vrot.lane.b32.xlu0 %v1034_v0, %s863_s20  ;;  %v1180_v0 = vld [vmem:[#allocation7 + $0x28] sm:$0xff]  ;;  %v383_v2 = vmul.f32 %v1164_v58, %v1050_v4 }
  0x71   : > { %317 = vrot.lane.b32.xlu1 %v1050_v4, %s863_s20  ;;  %315 = vrot.lane.b32.xlu0 %v1053_v5, %s863_s20 }
  0x75   : > { %321 = vrot.lane.b32.xlu1 %v1058_v6, %s863_s20  ;;  %319 = vrot.lane.b32.xlu0 %v1061_v7, %s863_s20 }
  0x79   : > { %325 = vrot.lane.b32.xlu1 %v1066_v8, %s863_s20  ;;  %323 = vrot.lane.b32.xlu0 %v1069_v9, %s863_s20 }
  0x7d   : > { %329 = vrot.lane.b32.xlu1 %v1074_v10, %s863_s20  ;;  %327 = vrot.lane.b32.xlu0 %v1077_v11, %s863_s20 }
  0x81   : > { %333 = vrot.lane.b32.xlu1 %v1082_v12, %s863_s20  ;;  %331 = vrot.lane.b32.xlu0 %v1085_v13, %s863_s20 }
  0x85   : > { %337 = vrot.lane.b32.xlu1 %v1090_v14, %s863_s20  ;;  %335 = vrot.lane.b32.xlu0 %v1093_v15, %s863_s20 }
  0xbb   : > { %v280_v16 = vpop.permute.xlu1 %279  ;;  %v276_v17 = vpop.permute.xlu0 %275 }
  0xbf   : > { %v282_v18 = vpop.permute.xlu1 %281  ;;  %v278_v19 = vpop.permute.xlu0 %277 }
  0xc3   : > { %v286_v20 = vpop.permute.xlu1 %285  ;;  %v284_v21 = vpop.permute.xlu0 %283 }
  0xc7   : > { %v1113_v22 = vpop.permute.xlu1 %289  ;;  %v1115_v23 = vpop.permute.xlu0 %287 }
  0xcb   : > { %v1117_v24 = vpop.permute.xlu1 %293  ;;  %v1119_v25 = vpop.permute.xlu0 %291 }
  0xcf   : > { %v1121_v27 = vpop.permute.xlu1 %297  ;;  %v1123_v28 = vpop.permute.xlu0 %295 }
  0xd3   : > { %v1125_v30 = vpop.permute.xlu1 %301  ;;  %v1127_v31 = vpop.permute.xlu0 %299 }
  0xd7   : > { %v1129_v33 = vpop.permute.xlu1 %305  ;;  %v1131_v34 = vpop.permute.xlu0 %303 }
  0xdb   : > { %v310_v42 = vpop.permute.xlu1 %309  ;;  %v308_v43 = vpop.permute.xlu0 %307 }
  0xdc   : > { %v355_v46 = vsel %vm1135_vm0, %v278_v19, %v310_v42  ;;  %v354_v47 = vsel %vm1135_vm0, %v276_v17, %v308_v43  ;;  %v400_v42 = vld [vmem:[#allocation7 + $0x30] sm:$0xff]  ;;  %v385_v43 = vmul.f32 %v377_v26, %v1058_v6 }
  0xdd   : > { %v403_v48 = vmul.f32 %v1139_v38, %v355_v46  ;;  %v402_v49 = vmul.f32 %v1141_v39, %v354_v47  ;;  %v384_v46 = vmul.f32 %v376_v29, %v1061_v7  ;;  %v387_v7 = vmul.f32 %v371_v36, %v1066_v8 }
  0xde   : > { %v388_v36 = vmul.f32 %v1146_v44, %v1077_v11  ;;  %v390_v44 = vmul.f32 %v1166_v59, %v1085_v13 }
  0xdf   : > { %v419_v54 = vadd.f32 %v403_v48, %v379_v41  ;;  %v418_v55 = vadd.f32 %v402_v49, %v378_v40  ;;  %v314_v56 = vpop.permute.xlu1 %313  ;;  %v312_v57 = vpop.permute.xlu0 %311  ;;  %v401_v41 = vld [vmem:[#allocation7 + $0x38] sm:$0xff] }
  0xe0   : > { %v357_v60 = vsel %vm1135_vm0, %v282_v18, %v314_v56  ;;  %v356_v61 = vsel %vm1135_vm0, %v280_v16, %v312_v57 }
  0xe1   : > { %435 = vst [vmem:[%s1174_s24 + $0x8] sm:$0xff] %v419_v54  ;;  %434 = vst [vmem:[%s1174_s24] sm:$0xff] %v418_v55  ;;  %v405_v62 = vmul.f32 %v1156_v50, %v357_v60  ;;  %v404_v63 = vmul.f32 %v1158_v51, %v356_v61  ;;  %v386_v54 = vmul.f32 %v1133_v35, %v1069_v9 }
  0xe2   : > { %v389_v35 = vmul.f32 %v1148_v45, %v1074_v10 }
  0xe3   : > { %v421_v16 = vadd.f32 %v405_v62, %v381_v53  ;;  %v420_v17 = vadd.f32 %v404_v63, %v380_v52  ;;  %v318_v18 = vpop.permute.xlu1 %317  ;;  %v316_v19 = vpop.permute.xlu0 %315 }
  0xe4   : > { %v359_v32 = vsel %vm1135_vm0, %v286_v20, %v318_v18  ;;  %v358_v40 = vsel %vm1135_vm0, %v284_v21, %v316_v19 }
  0xe5   : > { %437 = vst [vmem:[%s1174_s24 + $0x18] sm:$0xff] %v421_v16  ;;  %436 = vst [vmem:[%s1174_s24 + $0x10] sm:$0xff] %v420_v17  ;;  %v407_v4 = vmul.f32 %v1180_v0, %v359_v32  ;;  %v406_v5 = vmul.f32 %v1182_v1, %v358_v40 }
  0xe7   : > { %v423_v47 = vadd.f32 %v407_v4, %v383_v2  ;;  %v422_v48 = vadd.f32 %v406_v5, %v382_v3  ;;  %v322_v20 = vpop.permute.xlu1 %321  ;;  %v320_v49 = vpop.permute.xlu0 %319 }
  0xe8   : > { %v361_v21 = vsel %vm1135_vm0, %v1113_v22, %v322_v20  ;;  %v360_v52 = vsel %vm1135_vm0, %v1115_v23, %v320_v49 }
  0xe9   : > { %439 = vst [vmem:[%s1174_s24 + $0x28] sm:$0xff] %v423_v47  ;;  %438 = vst [vmem:[%s1174_s24 + $0x20] sm:$0xff] %v422_v48  ;;  %v409_v53 = vmul.f32 %v401_v41, %v361_v21  ;;  %v408_v6 = vmul.f32 %v400_v42, %v360_v52 }
  0xeb   : > { %v425_v55 = vadd.f32 %v409_v53, %v385_v43  ;;  %v424_v56 = vadd.f32 %v408_v6, %v384_v46  ;;  %v326_v57 = vpop.permute.xlu1 %325  ;;  %v324_v60 = vpop.permute.xlu0 %323 }
  0xec   : > { %v363_v22 = vsel %vm1135_vm0, %v1117_v24, %v326_v57  ;;  %v362_v23 = vsel %vm1135_vm0, %v1119_v25, %v324_v60 }
  0xed   : > { %441 = vst [vmem:[%s1174_s24 + $0x38] sm:$0xff] %v425_v55  ;;  %440 = vst [vmem:[%s1174_s24 + $0x30] sm:$0xff] %v424_v56  ;;  %v411_v8 = vmul.f32 %v1139_v38, %v363_v22  ;;  %v410_v9 = vmul.f32 %v1141_v39, %v362_v23  ;;  %v391_v39 = vmul.f32 %v1164_v58, %v1082_v12 }
  0xee   : > { %v392_v58 = vmul.f32 %v376_v29, %v1093_v15 }
  0xef   : > { %v427_v61 = vadd.f32 %v411_v8, %v387_v7  ;;  %v426_v62 = vadd.f32 %v410_v9, %v386_v54  ;;  %v330_v63 = vpop.permute.xlu1 %329  ;;  %v328_v24 = vpop.permute.xlu0 %327 }
  0xf0   : > { %v365_v25 = vsel %vm1135_vm0, %v1121_v27, %v330_v63  ;;  %v364_v38 = vsel %vm1135_vm0, %v1123_v28, %v328_v24 }
  0xf1   : > { %443 = vst [vmem:[%s1174_s24 + $0x48] sm:$0xff] %v427_v61  ;;  %442 = vst [vmem:[%s1174_s24 + $0x40] sm:$0xff] %v426_v62  ;;  %v413_v10 = vmul.f32 %v1156_v50, %v365_v25  ;;  %v412_v11 = vmul.f32 %v1158_v51, %v364_v38  ;;  %v393_v51 = vmul.f32 %v377_v26, %v1090_v14 }
  0xf3   : > { %v429_v45 = vadd.f32 %v413_v10, %v389_v35  ;;  %v428_v2 = vadd.f32 %v412_v11, %v388_v36  ;;  %v334_v27 = vpop.permute.xlu1 %333  ;;  %v332_v3 = vpop.permute.xlu0 %331 }
  0xf4   : > { %v367_v28 = vsel %vm1135_vm0, %v1125_v30, %v334_v27  ;;  %v366_v50 = vsel %vm1135_vm0, %v1127_v31, %v332_v3 }
  0xf5   : > { %445 = vst [vmem:[%s1174_s24 + $0x58] sm:$0xff] %v429_v45  ;;  %444 = vst [vmem:[%s1174_s24 + $0x50] sm:$0xff] %v428_v2  ;;  %v415_v12 = vmul.f32 %v1180_v0, %v367_v28  ;;  %v414_v13 = vmul.f32 %v1182_v1, %v366_v50 }
  0xf7   : > { %v431_v59 = vadd.f32 %v415_v12, %v391_v39  ;;  %v430_v16 = vadd.f32 %v414_v13, %v390_v44  ;;  %v338_v30 = vpop.permute.xlu1 %337  ;;  %v336_v17 = vpop.permute.xlu0 %335 }
  0xf8   : > { %v369_v31 = vsel %vm1135_vm0, %v1129_v33, %v338_v30  ;;  %v368_v14 = vsel %vm1135_vm0, %v1131_v34, %v336_v17 }
  0xf9   : > { %447 = vst [vmem:[%s1174_s24 + $0x68] sm:$0xff] %v431_v59  ;;  %446 = vst [vmem:[%s1174_s24 + $0x60] sm:$0xff] %v430_v16  ;;  %v417_v15 = vmul.f32 %v401_v41, %v369_v31  ;;  %v416_v0 = vmul.f32 %v400_v42, %v368_v14 }
  0xfb   : > { %v433_v1 = vadd.f32 %v417_v15, %v393_v51  ;;  %v432_v33 = vadd.f32 %v416_v0, %v392_v58 }
  0xfd   : > { %449 = vst [vmem:[%s1174_s24 + $0x78] sm:$0xff] %v433_v1  ;;  %448 = vst [vmem:[%s1174_s24 + $0x70] sm:$0xff] %v432_v33 }
  0xfe   : > { %784 = shalt.err (!%p781_p2)
}
  0xff   : > { %s785_s27 = scalar_lea.hbm %s1262_s21, 2048  ;;  %s789_s6 = scalar_lea.hbm %s1316_s3, 8192 }
 0x100   : > { %p786_p9 = scmp.ne.s32.totalorder %s1262_s21, %s785_s27  ;;  %p790_p13 = scmp.lt.s32.totalorder %s1262_s21, %s1316_s3 }
 0x101   : > { %p791_p7 = scmp.lt.s32.totalorder %s789_s6, %s785_s27 }
 0x102   : > { %p787_p11 = pnand %p786_p9, %p987_p5 }
 0x103   : > { %p792_p3 = por %p791_p7, %p790_p13 }
 0x104   : > { %p788_p12 = pneg %p787_p11 }
 0x106   : > { %p793_p1 = pnand %p792_p3, %p788_p12 }
 0x108   : > { %796 = shalt.err (!%p793_p1)
}
 0x109   : > { %s865_s24 = smov 128   ;;  %s866_s5 = smov 8  }
 0x10a   : > { %612 = dma.vmem_to_hbm [thread:$0]  (%p987_p5), %s1264_s7, 2048, %s1262_s21, %s451_s15, %s865_s24, %s865_s24, %s866_s5  }
 0x10b PF: > { %p634_p4 = scmp.ge.s32.totalorder %s855_s17, 2  ;;  %s482_s8 = sand.u32 1, %s835_s12  }
 0x10c   : > { %p1329_p6 = scmp.ne.s32.totalorder %s1321_s23, 0  ;;  %s483_s9 = scalar_lea.sflag [#allocation4], %s482_s8 }
 0x10e   : > { %p626_p8 = pnand %p634_p4, %p1329_p6 }
 0x110   : > { %p627_p0 = pneg %p626_p8 }
 0x112   : > { %830 = dma.done.wait (%p627_p0), %s483_s9, 2048  }
 0x113   : > { %832 = vsyncadd (%p627_p0), %s483_s9, 4294965248  ;;  %s20_s17 = sadd.s32 1, %s855_s17   ;;  %s1330_s12 = smov %s839_s13 }
 0x114   : > { %p17_p10 = scmp.ge.s32.totalorder %s20_s17, 6   ;;  %s1331_s13 = smov %s843_s14 }
 0x115   : > { %s1332_s14 = smov %s996_s29  ;;  %s1333_s15 = smov %s851_s16 }
 0x116   : > { %s1334_s16 = smov %s1336_s11  ;;  %19 = sbr.rel (!%p17_p10) target bundleno = 7 (0x7), region = 87 }
 0x11b   :  { %488 = vsyncpa [#allocation3], 1 }
 0x11c   :  { %490 = vsyncpa [#allocation3 + $0x1], 1 }
 0x11d   :  { %491 = vsyncpa [#allocation6], 1 }
 0x11e   :  { %492 = vsyncpa [#allocation4], 1 }
 0x11f   :  { %494 = vsyncpa [#allocation4 + $0x1], 1 }

</bundles_post_ra>
